<compile_context>
chip_gen: v6e
topology: v6e:2x2x1
jax: 0.10.0
libtpu: 0.0.40
codegen_flags: <defaults>
</compile_context>

<pallas_src>
import functools

import jax
import jax.numpy as jnp
from jax import lax
from jax.experimental import pallas as pl
from jax.experimental.pallas import tpu as pltpu

_NEG_BIG = -1e30   # finite "-inf": exp() underflows to exactly 0, no nan risk
_LANES = 128       # TPU vreg lane width


def _gc_kernel(x_ref, wk_ref, w1t_ref, b1_ref, w2t_ref, b2_ref,
               o_ref, m_sc, l_sc, acc_sc,
               *, n_valid, block_n, needs_mask, approx_recip):
    # x_ref   : (Bt, C, TN)        streamed activation tile (bf16 or f32)
    # wk_ref  : (1, C)  f32        to_k 1x1 conv weight (bias dropped: softmax no-op)
    # w1t_ref : (C, hidden)        net[0] weight, transposed (compute dtype)
    # b1_ref  : (1, hidden)
    # w2t_ref : (hidden, dim_out)  net[2] weight, transposed (compute dtype)
    # b2_ref  : (1, dim_out)
    # o_ref   : (Bt, dim_out) f32  sigmoid output slab
    # scratch : m_sc (Bt,1,1), l_sc (Bt,1,1), acc_sc (Bt,C,128) lane partials
    ni = pl.program_id(1)
    n_steps = pl.num_programs(1)

    @pl.when(ni == 0)
    def _init():
        m_sc[...] = jnp.full_like(m_sc, _NEG_BIG)
        l_sc[...] = jnp.zeros_like(l_sc)
        acc_sc[...] = jnp.zeros_like(acc_sc)

    xb = x_ref[...]                                         # (Bt, C, TN)
    bt, c, tn = xb.shape

    # ---- context = to_k(x): VPU multiply + sublane reduce over C ----------
    # (1x1 conv with one output channel == weighted channel sum; f32 accumulate
    #  via implicit promotion of the bf16 tile.)
    wk = wk_ref[...].reshape(1, c, 1)                       # f32 (1, C, 1)
    ctx = jnp.sum(wk * xb, axis=1, keepdims=True)           # (Bt, 1, TN) f32

    if needs_mask:
        # Only emitted when spatial padding exists; operates on the thin
        # (Bt,1,TN) context row only (non-last tiles are all-valid anyway).
        pos = ni * block_n + lax.broadcasted_iota(jnp.int32, ctx.shape, 2)
        ctx = jnp.where(pos < n_valid, ctx, _NEG_BIG)

    # ---- online softmax over the spatial axis ------------------------------
    m_prev = m_sc[...]                                      # (Bt,1,1)
    m_new = jnp.maximum(m_prev, jnp.max(ctx, axis=-1, keepdims=True))
    alpha = jnp.exp(m_prev - m_new)                         # (Bt,1,1)
    p = jnp.exp(ctx - m_new)                                # (Bt,1,TN) f32 (kept f32)
    l_sc[...] = alpha * l_sc[...] + jnp.sum(p, axis=-1, keepdims=True)
    m_sc[...] = m_new

    # ---- pooled accumulation as 128-wide lane partials (pure VPU) ----------
    # acc_sc[b,c,l] accumulates sum over spatial columns n with n % 128 == l;
    # the single 128 -> 1 lane (XLU) reduce happens once at finalize, so the
    # per-tile inner loop is pure VALU and hides under the x DMA.
    acc = acc_sc[...] * alpha                               # (Bt, C, 128) f32
    for k0 in range(0, tn, _LANES):                         # static, vreg-aligned slices
        acc = acc + p[:, :, k0:k0 + _LANES] * xb[:, :, k0:k0 + _LANES]
    acc_sc[...] = acc

    @pl.when(ni == n_steps - 1)
    def _finalize():
        pooled = jnp.sum(acc_sc[...], axis=-1)              # (Bt, C) one lane reduce
        inv_l = pl.reciprocal(l_sc[...].reshape(bt, 1), approx=approx_recip)
        pooled = pooled * inv_l                             # softmax normalization
        # net: two 1x1 convs on a (C,1,1) tensor == dense layers, batched over Bt.
        w1 = w1t_ref[...].astype(jnp.float32)
        b1 = b1_ref[...].astype(jnp.float32)
        w2 = w2t_ref[...].astype(jnp.float32)
        b2 = b2_ref[...].astype(jnp.float32)
        h = jnp.dot(pooled, w1, preferred_element_type=jnp.float32) + b1
        h = h * jax.nn.sigmoid(h)                           # Swish
        o = jax.nn.sigmoid(jnp.dot(h, w2, preferred_element_type=jnp.float32) + b2)
        o_ref[...] = o.astype(o_ref.dtype)


def global_context_pallas(x_nchw, params, *, compute_dtype=jnp.bfloat16,
                          block_n_cap=2048, block_b_cap=8):
    """x_nchw: (B, C, H, W). Returns (B, dim_out, 1, 1) float32."""
    B, C, H, W = x_nchw.shape
    N = H * W

    # to_k weight stays f32 (tiny; keeps the f32 path exact). Its bias is a
    # softmax no-op and is not passed to the kernel at all.
    wk = params["wk"].astype(jnp.float32)               # (1, C)
    # `net` weights are only touched once per batch tile (finalize), so store
    # them in the streaming dtype to shrink the resident VMEM footprint.
    w1t = params["w1t"].astype(compute_dtype)           # (C, hidden)
    b1 = params["b1"].astype(compute_dtype)             # (1, hidden)
    w2t = params["w2t"].astype(compute_dtype)           # (hidden, dim_out)
    b2 = params["b2"].astype(compute_dtype)             # (1, dim_out)
    hidden = w1t.shape[1]
    dim_out = w2t.shape[1]

    x = x_nchw.reshape(B, C, N).astype(compute_dtype)
    itemsize = jnp.dtype(compute_dtype).itemsize

    # ---- batch tiling -------------------------------------------------------
    # Small batches run as a single step (block == full dim, no alignment
    # constraint).  Larger batches get sublane-aligned tiles with >= 2 batch
    # steps so the "parallel" axis can shard across v7x's two TensorCores.
    if B <= 8:
        Bt = B
    else:
        Bt = max(8, (min(block_b_cap, pl.cdiv(B, 2)) // 8) * 8)

    # ---- spatial tiling -----------------------------------------------------
    budget = 4 << 20                                     # target bytes / x tile
    n128 = pl.cdiv(N, 128) * 128
    cap_user = max(128, (block_n_cap // 128) * 128)
    tn_floor = min(512, n128, cap_user)                  # keep DMA rows long
    # prefer shrinking a tileable Bt over dropping TN below the floor
    while B > 8 and Bt > 8 and Bt * C * tn_floor * itemsize > budget:
        Bt -= 8
    budget_n = budget // max(1, Bt * C * itemsize)
    tn_budget = max(tn_floor, (budget_n // 128) * 128)
    tn_cap = min(cap_user, tn_budget)
    TN = n128 if n128 <= tn_cap else tn_cap
    # safety: never let the double-buffered x stream exceed ~48 MiB of VMEM
    while TN > 128 and 2 * Bt * C * TN * itemsize > (48 << 20):
        TN = max(128, ((TN // 2) // 128) * 128)

    B_pad = pl.cdiv(B, Bt) * Bt
    N_pad = pl.cdiv(N, TN) * TN
    pad_b, pad_n = B_pad - B, N_pad - N
    if pad_b or pad_n:
        x = jnp.pad(x, ((0, pad_b), (0, 0), (0, pad_n)))
    needs_mask = pad_n > 0

    grid = (B_pad // Bt, N_pad // TN)

    # ---- explicit VMEM budget (x double-buffer + weights + scratch + temps) --
    x_tile_bytes = Bt * C * TN * itemsize
    weight_bytes = sum(int(a.size) * a.dtype.itemsize for a in (wk, w1t, b1, w2t, b2))
    acc_bytes = Bt * C * _LANES * 4
    temp_bytes = 2 * Bt * C * TN * 4                     # f32 intermediates of the VPU path
    vmem_limit = 2 * x_tile_bytes + 2 * weight_bytes + acc_bytes + temp_bytes + (4 << 20)
    vmem_limit = int(min(96 << 20, max(32 << 20, vmem_limit)))

    kernel = functools.partial(
        _gc_kernel, n_valid=N, block_n=TN, needs_mask=needs_mask,
        approx_recip=(jnp.dtype(compute_dtype) != jnp.dtype(jnp.float32)))

    out = pl.pallas_call(
        kernel,
        out_shape=jax.ShapeDtypeStruct((B_pad, dim_out), jnp.float32),
        grid_spec=pltpu.PrefetchScalarGridSpec(
            num_scalar_prefetch=0,
            grid=grid,
            in_specs=[
                pl.BlockSpec((Bt, C, TN), lambda b, n: (b, 0, n)),     # streamed x
                pl.BlockSpec((1, C), lambda b, n: (0, 0)),             # to_k weight
                pl.BlockSpec((C, hidden), lambda b, n: (0, 0)),        # net[0] weight^T
                pl.BlockSpec((1, hidden), lambda b, n: (0, 0)),        # net[0] bias
                pl.BlockSpec((hidden, dim_out), lambda b, n: (0, 0)),  # net[2] weight^T
                pl.BlockSpec((1, dim_out), lambda b, n: (0, 0)),       # net[2] bias
            ],
            out_specs=pl.BlockSpec((Bt, dim_out), lambda b, n: (b, 0)),
            scratch_shapes=[
                pltpu.VMEM((Bt, 1, 1), jnp.float32),        # running max
                pltpu.VMEM((Bt, 1, 1), jnp.float32),        # running denominator
                pltpu.VMEM((Bt, C, _LANES), jnp.float32),   # pooled lane partials
            ],
        ),
        compiler_params=pltpu.CompilerParams(
            dimension_semantics=("parallel", "arbitrary"),
            vmem_limit_bytes=vmem_limit),
    )(x, wk, w1t, b1, w2t, b2)

    return out[:B].reshape(B, dim_out, 1, 1)


def global_context_ref(x_nchw, params):
    """Pure-JAX reference matching the PyTorch forward (f32)."""
    B, C, H, W = x_nchw.shape
    N = H * W
    x = x_nchw.reshape(B, C, N)
    ctx = jnp.einsum("oc,bcn->bon", params["wk"], x) + params["bk"][0, 0]  # (B,1,N)
    soft = jax.nn.softmax(ctx, axis=-1)
    pooled = jnp.einsum("bin,bcn->bci", soft, x)[..., 0]                   # (B,C)
    h = pooled @ params["w1t"] + params["b1"]
    h = h * jax.nn.sigmoid(h)
    o = jax.nn.sigmoid(h @ params["w2t"] + params["b2"])
    return o.reshape(B, -1, 1, 1)


def make_params(key, dim_in, dim_out):
    hidden = max(3, dim_out // 2)
    ks = jax.random.split(key, 6)
    scale = 0.1
    return {
        "wk": scale * jax.random.normal(ks[0], (1, dim_in), jnp.float32),
        "bk": scale * jax.random.normal(ks[1], (1, 1), jnp.float32),
        "w1t": scale * jax.random.normal(ks[2], (dim_in, hidden), jnp.float32),
        "b1": scale * jax.random.normal(ks[3], (1, hidden), jnp.float32),
        "w2t": scale * jax.random.normal(ks[4], (hidden, dim_out), jnp.float32),
        "b2": scale * jax.random.normal(ks[5], (1, dim_out), jnp.float32),
    }


if __name__ == "__main__":
    key = jax.random.PRNGKey(0)
    k_x1, k_p1, k_x2, k_p2 = jax.random.split(key, 4)

    # Test 1: aligned spatial size, bf16 streaming (default fast path).
    B, dim_in, H, W = 2, 4, 16, 16
    dim_out = 8
    x = jax.random.normal(k_x1, (B, dim_in, H, W), jnp.float32)
    params = make_params(k_p1, dim_in, dim_out)
    out = jax.block_until_ready(global_context_pallas(x, params))
    ref = global_context_ref(x, params)
    assert out.shape == (B, dim_out, 1, 1), out.shape
    assert jnp.allclose(out, ref, atol=3e-2, rtol=3e-2), (
        "mismatch (bf16 path)", float(jnp.max(jnp.abs(out - ref))))

    # Test 2: unaligned spatial size -> padded + masked online softmax across
    # two N tiles; f32 compute path (exact reciprocal).
    B2, dim_in2, H2, W2 = 3, 8, 13, 13
    dim_out2 = 6
    x2 = jax.random.normal(k_x2, (B2, dim_in2, H2, W2), jnp.float32)
    params2 = make_params(k_p2, dim_in2, dim_out2)
    out2 = jax.block_until_ready(
        global_context_pallas(x2, params2, compute_dtype=jnp.float32,
                              block_n_cap=128))
    ref2 = global_context_ref(x2, params2)
    assert out2.shape == (B2, dim_out2, 1, 1), out2.shape
    assert jnp.allclose(out2, ref2, atol=1e-2, rtol=1e-2), (
        "mismatch (f32 masked path)", float(jnp.max(jnp.abs(out2 - ref2))))

    print("KERNEL_OK")
</pallas_src>

<mosaic_0001>
module attributes {stable_mosaic.version = 11 : i64} {
  func.func @_gc_kernel(%arg0: i32, %arg1: i32, %arg2: memref<2x4x256xbf16, #tpu.memory_space<vmem>>, %arg3: memref<1x4xf32, #tpu.memory_space<vmem>>, %arg4: memref<4x4xbf16, #tpu.memory_space<vmem>>, %arg5: memref<1x4xbf16, #tpu.memory_space<vmem>>, %arg6: memref<4x8xbf16, #tpu.memory_space<vmem>>, %arg7: memref<1x8xbf16, #tpu.memory_space<vmem>>, %arg8: memref<2x8xf32, #tpu.memory_space<vmem>>, %arg9: memref<2x1x1xf32, #tpu.memory_space<vmem>>, %arg10: memref<2x1x1xf32, #tpu.memory_space<vmem>>, %arg11: memref<2x4x128xf32, #tpu.memory_space<vmem>>) attributes {dimension_semantics = [#tpu.dimension_semantics<parallel>, #tpu.dimension_semantics<arbitrary>], iteration_bounds = array<i64: 1, 1>, scalar_prefetch = 0 : i64, scratch_operands = 3 : i64, tpu.core_type = #tpu.core_type<tc>, window_params = [{transform_indices = @transform_0, window_bounds = array<i64: 2, 4, 256>}, {pipeline_mode = #tpu.pipeline_mode<synchronous>, transform_indices = @transform_1, window_bounds = array<i64: 1, 4>}, {pipeline_mode = #tpu.pipeline_mode<synchronous>, transform_indices = @transform_2, window_bounds = array<i64: 4, 4>}, {pipeline_mode = #tpu.pipeline_mode<synchronous>, transform_indices = @transform_3, window_bounds = array<i64: 1, 4>}, {pipeline_mode = #tpu.pipeline_mode<synchronous>, transform_indices = @transform_4, window_bounds = array<i64: 4, 8>}, {pipeline_mode = #tpu.pipeline_mode<synchronous>, transform_indices = @transform_5, window_bounds = array<i64: 1, 8>}, {transform_indices = @transform_6, window_bounds = array<i64: 2, 8>}]} {
    %c0_i32 = arith.constant 0 : i32
    %0 = arith.cmpi eq, %arg1, %c0_i32 : i32
    %1 = arith.extui %0 : i1 to i32
    %c0_i32_0 = arith.constant 0 : i32
    %2 = arith.cmpi ne, %1, %c0_i32_0 : i32
    scf.if %2 {
      %cst_27 = arith.constant -1.000000e+30 : f32
      %46 = vector.broadcast %cst_27 : f32 to vector<2x1x1xf32>
      %c0_28 = arith.constant 0 : index
      %c0_29 = arith.constant 0 : index
      %c0_30 = arith.constant 0 : index
      %47 = vector.load %arg9[%c0_28, %c0_29, %c0_30] : memref<2x1x1xf32, #tpu.memory_space<vmem>>, vector<2x1x1xf32>
      tpu.vector_store %arg9[%c0_28, %c0_29, %c0_30], %46 {strides = array<i32>} : memref<2x1x1xf32, #tpu.memory_space<vmem>>, vector<2x1x1xf32>,
      %cst_31 = arith.constant 0.000000e+00 : f32
      %48 = vector.broadcast %cst_31 : f32 to vector<2x1x1xf32>
      %c0_32 = arith.constant 0 : index
      %c0_33 = arith.constant 0 : index
      %c0_34 = arith.constant 0 : index
      %49 = vector.load %arg10[%c0_32, %c0_33, %c0_34] : memref<2x1x1xf32, #tpu.memory_space<vmem>>, vector<2x1x1xf32>
      tpu.vector_store %arg10[%c0_32, %c0_33, %c0_34], %48 {strides = array<i32>} : memref<2x1x1xf32, #tpu.memory_space<vmem>>, vector<2x1x1xf32>,
      %cst_35 = arith.constant 0.000000e+00 : f32
      %50 = vector.broadcast %cst_35 : f32 to vector<2x4x128xf32>
      %c0_36 = arith.constant 0 : index
      %c0_37 = arith.constant 0 : index
      %c0_38 = arith.constant 0 : index
      %51 = vector.load %arg11[%c0_36, %c0_37, %c0_38] : memref<2x4x128xf32, #tpu.memory_space<vmem>>, vector<2x4x128xf32>
      tpu.vector_store %arg11[%c0_36, %c0_37, %c0_38], %50 {strides = array<i32>} : memref<2x4x128xf32, #tpu.memory_space<vmem>>, vector<2x4x128xf32>,
    } else {
    }
    %c0 = arith.constant 0 : index
    %c0_1 = arith.constant 0 : index
    %c0_2 = arith.constant 0 : index
    %3 = vector.load %arg2[%c0, %c0_1, %c0_2] : memref<2x4x256xbf16, #tpu.memory_space<vmem>>, vector<2x4x256xbf16>
    %c0_3 = arith.constant 0 : index
    %c0_4 = arith.constant 0 : index
    %4 = vector.load %arg3[%c0_3, %c0_4] : memref<1x4xf32, #tpu.memory_space<vmem>>, vector<1x4xf32>
    %5 = vector.shape_cast %4 : vector<1x4xf32> to vector<1x4x1xf32>
    %6 = arith.extf %3 : vector<2x4x256xbf16> to vector<2x4x256xf32>
    %7 = vector.broadcast %5 : vector<1x4x1xf32> to vector<2x4x256xf32>
    %8 = arith.mulf %7, %6 : vector<2x4x256xf32>
    %cst = arith.constant dense<0.000000e+00> : vector<2x256xf32>
    %9 = vector.multi_reduction <add>, %8, %cst [1] : vector<2x4x256xf32> to vector<2x256xf32>
    %10 = vector.shape_cast %9 : vector<2x256xf32> to vector<2x1x256xf32>
    %c0_5 = arith.constant 0 : index
    %c0_6 = arith.constant 0 : index
    %c0_7 = arith.constant 0 : index
    %11 = vector.load %arg9[%c0_5, %c0_6, %c0_7] : memref<2x1x1xf32, #tpu.memory_space<vmem>>, vector<2x1x1xf32>
    %cst_8 = arith.constant dense<0xFF800000> : vector<2x1xf32>
    %12 = vector.multi_reduction <maximumf>, %10, %cst_8 [2] : vector<2x1x256xf32> to vector<2x1xf32>
    %13 = vector.shape_cast %12 : vector<2x1xf32> to vector<2x1x1xf32>
    %14 = arith.maximumf %11, %13 : vector<2x1x1xf32>
    %15 = arith.subf %11, %14 : vector<2x1x1xf32>
    %16 = math.exp %15 : vector<2x1x1xf32>
    %17 = vector.broadcast %14 : vector<2x1x1xf32> to vector<2x1x256xf32>
    %18 = arith.subf %10, %17 : vector<2x1x256xf32>
    %19 = math.exp %18 : vector<2x1x256xf32>
    %c0_9 = arith.constant 0 : index
    %c0_10 = arith.constant 0 : index
    %c0_11 = arith.constant 0 : index
    %20 = vector.load %arg10[%c0_9, %c0_10, %c0_11] : memref<2x1x1xf32, #tpu.memory_space<vmem>>, vector<2x1x1xf32>
    %21 = arith.mulf %16, %20 : vector<2x1x1xf32>
    %cst_12 = arith.constant dense<0.000000e+00> : vector<2x1xf32>
    %22 = vector.multi_reduction <add>, %19, %cst_12 [2] : vector<2x1x256xf32> to vector<2x1xf32>
    %23 = vector.shape_cast %22 : vector<2x1xf32> to vector<2x1x1xf32>
    %24 = arith.addf %21, %23 : vector<2x1x1xf32>
    %c0_13 = arith.constant 0 : index
    %c0_14 = arith.constant 0 : index
    %c0_15 = arith.constant 0 : index
    %25 = vector.load %arg10[%c0_13, %c0_14, %c0_15] : memref<2x1x1xf32, #tpu.memory_space<vmem>>, vector<2x1x1xf32>
    tpu.vector_store %arg10[%c0_13, %c0_14, %c0_15], %24 {strides = array<i32>} : memref<2x1x1xf32, #tpu.memory_space<vmem>>, vector<2x1x1xf32>,
    %c0_16 = arith.constant 0 : index
    %c0_17 = arith.constant 0 : index
    %c0_18 = arith.constant 0 : index
    %26 = vector.load %arg9[%c0_16, %c0_17, %c0_18] : memref<2x1x1xf32, #tpu.memory_space<vmem>>, vector<2x1x1xf32>
    tpu.vector_store %arg9[%c0_16, %c0_17, %c0_18], %14 {strides = array<i32>} : memref<2x1x1xf32, #tpu.memory_space<vmem>>, vector<2x1x1xf32>,
    %c0_19 = arith.constant 0 : index
    %c0_20 = arith.constant 0 : index
    %c0_21 = arith.constant 0 : index
    %27 = vector.load %arg11[%c0_19, %c0_20, %c0_21] : memref<2x4x128xf32, #tpu.memory_space<vmem>>, vector<2x4x128xf32>
    %28 = vector.broadcast %16 : vector<2x1x1xf32> to vector<2x4x128xf32>
    %29 = arith.mulf %27, %28 : vector<2x4x128xf32>
    %30 = vector.extract_strided_slice %19 {offsets = [0, 0, 0], sizes = [2, 1, 128], strides = [1, 1, 1]} : vector<2x1x256xf32> to vector<2x1x128xf32>
    %31 = vector.extract_strided_slice %3 {offsets = [0, 0, 0], sizes = [2, 4, 128], strides = [1, 1, 1]} : vector<2x4x256xbf16> to vector<2x4x128xbf16>
    %32 = arith.extf %31 : vector<2x4x128xbf16> to vector<2x4x128xf32>
    %33 = vector.broadcast %30 : vector<2x1x128xf32> to vector<2x4x128xf32>
    %34 = arith.mulf %33, %32 : vector<2x4x128xf32>
    %35 = arith.addf %29, %34 : vector<2x4x128xf32>
    %36 = vector.extract_strided_slice %19 {offsets = [0, 0, 128], sizes = [2, 1, 128], strides = [1, 1, 1]} : vector<2x1x256xf32> to vector<2x1x128xf32>
    %37 = vector.extract_strided_slice %3 {offsets = [0, 0, 128], sizes = [2, 4, 128], strides = [1, 1, 1]} : vector<2x4x256xbf16> to vector<2x4x128xbf16>
    %38 = arith.extf %37 : vector<2x4x128xbf16> to vector<2x4x128xf32>
    %39 = vector.broadcast %36 : vector<2x1x128xf32> to vector<2x4x128xf32>
    %40 = arith.mulf %39, %38 : vector<2x4x128xf32>
    %41 = arith.addf %35, %40 : vector<2x4x128xf32>
    %c0_22 = arith.constant 0 : index
    %c0_23 = arith.constant 0 : index
    %c0_24 = arith.constant 0 : index
    %42 = vector.load %arg11[%c0_22, %c0_23, %c0_24] : memref<2x4x128xf32, #tpu.memory_space<vmem>>, vector<2x4x128xf32>
    tpu.vector_store %arg11[%c0_22, %c0_23, %c0_24], %41 {strides = array<i32>} : memref<2x4x128xf32, #tpu.memory_space<vmem>>, vector<2x4x128xf32>,
    %c0_i32_25 = arith.constant 0 : i32
    %43 = arith.cmpi eq, %arg1, %c0_i32_25 : i32
    %44 = arith.extui %43 : i1 to i32
    %c0_i32_26 = arith.constant 0 : i32
    %45 = arith.cmpi ne, %44, %c0_i32_26 : i32
    scf.if %45 {
      %c0_27 = arith.constant 0 : index
      %c0_28 = arith.constant 0 : index
      %c0_29 = arith.constant 0 : index
      %46 = vector.load %arg11[%c0_27, %c0_28, %c0_29] : memref<2x4x128xf32, #tpu.memory_space<vmem>>, vector<2x4x128xf32>
      %cst_30 = arith.constant dense<0.000000e+00> : vector<2x4xf32>
      %47 = vector.multi_reduction <add>, %46, %cst_30 [2] : vector<2x4x128xf32> to vector<2x4xf32>
      %c0_31 = arith.constant 0 : index
      %c0_32 = arith.constant 0 : index
      %c0_33 = arith.constant 0 : index
      %48 = vector.load %arg10[%c0_31, %c0_32, %c0_33] : memref<2x1x1xf32, #tpu.memory_space<vmem>>, vector<2x1x1xf32>
      %49 = vector.shape_cast %48 : vector<2x1x1xf32> to vector<2x1xf32>
      %50 = tpu.reciprocal %49 {approx = true} : vector<2x1xf32> -> vector<2x1xf32>
      %51 = vector.broadcast %50 : vector<2x1xf32> to vector<2x4xf32>
      %52 = arith.mulf %47, %51 : vector<2x4xf32>
      %c0_34 = arith.constant 0 : index
      %c0_35 = arith.constant 0 : index
      %53 = vector.load %arg4[%c0_34, %c0_35] : memref<4x4xbf16, #tpu.memory_space<vmem>>, vector<4x4xbf16>
      %54 = arith.extf %53 : vector<4x4xbf16> to vector<4x4xf32>
      %c0_36 = arith.constant 0 : index
      %c0_37 = arith.constant 0 : index
      %55 = vector.load %arg5[%c0_36, %c0_37] : memref<1x4xbf16, #tpu.memory_space<vmem>>, vector<1x4xbf16>
      %56 = arith.extf %55 : vector<1x4xbf16> to vector<1x4xf32>
      %c0_38 = arith.constant 0 : index
      %c0_39 = arith.constant 0 : index
      %57 = vector.load %arg6[%c0_38, %c0_39] : memref<4x8xbf16, #tpu.memory_space<vmem>>, vector<4x8xbf16>
      %58 = arith.extf %57 : vector<4x8xbf16> to vector<4x8xf32>
      %c0_40 = arith.constant 0 : index
      %c0_41 = arith.constant 0 : index
      %59 = vector.load %arg7[%c0_40, %c0_41] : memref<1x8xbf16, #tpu.memory_space<vmem>>, vector<1x8xbf16>
      %60 = arith.extf %59 : vector<1x8xbf16> to vector<1x8xf32>
      %cst_42 = arith.constant dense<0.000000e+00> : vector<2x4xf32>
      %61 = tpu.matmul %52, %54, %cst_42 {dimension_numbers = #tpu.dot_dimension_numbers<[1], [0], [0], [1], [0, 0, 1, 1], [], []>} : vector<2x4xf32>, vector<4x4xf32>, vector<2x4xf32> -> vector<2x4xf32>
      %62 = vector.broadcast %56 : vector<1x4xf32> to vector<2x4xf32>
      %63 = arith.addf %61, %62 : vector<2x4xf32>
      %64 = arith.negf %63 : vector<2x4xf32>
      %65 = math.exp %64 : vector<2x4xf32>
      %cst_43 = arith.constant 1.000000e+00 : f32
      %66 = vector.broadcast %cst_43 : f32 to vector<2x4xf32>
      %67 = arith.addf %66, %65 : vector<2x4xf32>
      %68 = arith.divf %66, %67 : vector<2x4xf32>
      %69 = arith.mulf %63, %68 : vector<2x4xf32>
      %cst_44 = arith.constant dense<0.000000e+00> : vector<2x8xf32>
      %70 = tpu.matmul %69, %58, %cst_44 {dimension_numbers = #tpu.dot_dimension_numbers<[1], [0], [0], [1], [0, 0, 1, 1], [], []>} : vector<2x4xf32>, vector<4x8xf32>, vector<2x8xf32> -> vector<2x8xf32>
      %71 = vector.broadcast %60 : vector<1x8xf32> to vector<2x8xf32>
      %72 = arith.addf %70, %71 : vector<2x8xf32>
      %73 = arith.negf %72 : vector<2x8xf32>
      %74 = math.exp %73 : vector<2x8xf32>
      %cst_45 = arith.constant 1.000000e+00 : f32
      %75 = vector.broadcast %cst_45 : f32 to vector<2x8xf32>
      %76 = arith.addf %75, %74 : vector<2x8xf32>
      %77 = arith.divf %75, %76 : vector<2x8xf32>
      %c0_46 = arith.constant 0 : index
      %c0_47 = arith.constant 0 : index
      %78 = vector.load %arg8[%c0_46, %c0_47] : memref<2x8xf32, #tpu.memory_space<vmem>>, vector<2x8xf32>
      tpu.vector_store %arg8[%c0_46, %c0_47], %77 {strides = array<i32>} : memref<2x8xf32, #tpu.memory_space<vmem>>, vector<2x8xf32>,
    } else {
    }
    return
  }
  func.func @transform_0(%arg0: i32, %arg1: i32) -> (i32, i32, i32) {
    %c0_i32 = arith.constant 0 : i32
    %c0_i32_0 = arith.constant 0 : i32
    return %arg0, %c0_i32, %arg1 : i32, i32, i32
  }
  func.func @transform_1(%arg0: i32, %arg1: i32) -> (i32, i32) {
    %c0_i32 = arith.constant 0 : i32
    %c0_i32_0 = arith.constant 0 : i32
    %c0_i32_1 = arith.constant 0 : i32
    return %c0_i32, %c0_i32_0 : i32, i32
  }
  func.func @transform_2(%arg0: i32, %arg1: i32) -> (i32, i32) {
    %c0_i32 = arith.constant 0 : i32
    %c0_i32_0 = arith.constant 0 : i32
    %c0_i32_1 = arith.constant 0 : i32
    return %c0_i32, %c0_i32_0 : i32, i32
  }
  func.func @transform_3(%arg0: i32, %arg1: i32) -> (i32, i32) {
    %c0_i32 = arith.constant 0 : i32
    %c0_i32_0 = arith.constant 0 : i32
    %c0_i32_1 = arith.constant 0 : i32
    return %c0_i32, %c0_i32_0 : i32, i32
  }
  func.func @transform_4(%arg0: i32, %arg1: i32) -> (i32, i32) {
    %c0_i32 = arith.constant 0 : i32
    %c0_i32_0 = arith.constant 0 : i32
    %c0_i32_1 = arith.constant 0 : i32
    return %c0_i32, %c0_i32_0 : i32, i32
  }
  func.func @transform_5(%arg0: i32, %arg1: i32) -> (i32, i32) {
    %c0_i32 = arith.constant 0 : i32
    %c0_i32_0 = arith.constant 0 : i32
    %c0_i32_1 = arith.constant 0 : i32
    return %c0_i32, %c0_i32_0 : i32, i32
  }
  func.func @transform_6(%arg0: i32, %arg1: i32) -> (i32, i32) {
    %c0_i32 = arith.constant 0 : i32
    %c0_i32_0 = arith.constant 0 : i32
    return %arg0, %c0_i32 : i32, i32
  }
}

</mosaic_0001>

<bundles_post_ra>
// kernel: tpu_custom_call.1
= control target key start
LH: loop header
LB: loop body
LE: loop exit
PB: predicated region body
PF: predicated region fallthrough
CT: control target
= control target key end

     0   :  { %11 = vsyncpa [#allocation6], 0  ;;  %s756_s0 = inlined_call_operand.hbm [shape: bf16[2,4,256], index: 0, kind: input, shape index: {}]   ;;  %s757_s1 = inlined_call_operand.vmem [shape: f32[1,4], index: 1, kind: input, shape index: {}]   ;;  %s758_s2 = inlined_call_operand.vmem [shape: bf16[4,4], index: 2, kind: input, shape index: {}]   ;;  %s759_s3 = inlined_call_operand.hbm [shape: bf16[1,4], index: 3, kind: input, shape index: {}]   ;;  %s760_s4 = inlined_call_operand.vmem [shape: bf16[4,8], index: 4, kind: input, shape index: {}]   ;;  %s761_s5 = inlined_call_operand.vmem [shape: bf16[1,8], index: 5, kind: input, shape index: {}]   ;;  %s762_s6 = inlined_call_operand.hbm [shape: f32[2,8], index: 6, kind: output, shape index: {}]  }
   0x1   :  { %12 = vsyncpa [#allocation9], 0 }
   0x2   :  { %13 = vsyncpa [#allocation7], 0  ;;  %s625_s21 = smov [#allocation5]  }
   0x3   :  { %s19_s22 = sshll.u32 %s625_s21, 4  ;;  %s20_s22 = int_to_ptr.vmem [resolvable:$true] %s19_s22 }
   0x4   :  { %s567_s23 = scalar_lea.vmem %s20_s22, 128  ;;  %p572_p1 = scmp.lt.s32.totalorder %s20_s22, %s20_s22 }
   0x5   :  { %p568_p0 = scmp.ne.s32.totalorder %s20_s22, %s567_s23  ;;  %p573_p2 = scmp.lt.s32.totalorder %s567_s23, %s567_s23 }
   0x7   :  { %p574_p3 = por %p573_p2, %p572_p1 }
   0x9   :  { %p575_p4 = pnand %p574_p3, %p568_p0 }
   0xb   :  { %578 = shalt.err (!%p575_p4)
}
   0xc   :  { %s626_s24 = smov 64   ;;  %s627_s25 = smov 4  }
   0xd   :  { %25 = dma.hbm_to_vmem [thread:$0]  %s756_s0, 128, %s20_s22, [#allocation6], %s626_s24, %s626_s24, %s627_s25  }
   0xe   :  { %s628_s28 = smov [#allocation8]  }
   0xf   :  { %s36_s29 = sshll.u32 %s628_s28, 4  ;;  %s37_s29 = int_to_ptr.vmem [resolvable:$true] %s36_s29 }
  0x10   :  { %s587_s30 = scalar_lea.vmem %s37_s29, 16  ;;  %s591_s7 = scalar_lea.vmem %s37_s29, 32 }
  0x11   :  { %p588_p5 = scmp.ne.s32.totalorder %s37_s29, %s587_s30  ;;  %p592_p6 = scmp.lt.s32.totalorder %s37_s29, %s37_s29 }
  0x12   :  { %p593_p7 = scmp.lt.s32.totalorder %s591_s7, %s587_s30 }
  0x14   :  { %p594_p8 = por %p593_p7, %p592_p6 }
  0x16   :  { %p595_p9 = pnand %p594_p8, %p588_p5 }
  0x18   :  { %598 = shalt.err (!%p595_p9)
}
  0x19   :  { %39 = dma.hbm_to_vmem [thread:$0]  %s759_s3, 16, %s37_s29, [#allocation9]  }
  0x1a   :  { %619 = dma.done.wait [#allocation6], 128  }
  0x1b   :  { %620 = vsyncadd [#allocation6], 4294967168 }
  0x1c   :  { %621 = dma.done.wait [#allocation9], 16  }
  0x1d   :  { %622 = vsyncadd [#allocation9], 4294967280  ;;  %v502_v0 = vld [vmem:[%s757_s1] ss:$0 sm:$0xff]  ;;  %vm54_vm0 = vcmask 0   ;;  %vm83_vm1 = vcmask 1043456   ;;  %v133_v53 = vlaneseq }
  0x1e   :  { %69 = vbcast.lane.b32.xlu0 %v502_v0, 256  ;;  %v629_v1 = vmov -1e+30   ;;  %v681_v2 = vld [vmem:[#allocation5] sm:$0xf]  ;;  %v630_v43 = vmov 0  }
  0x1f   :  { %56 = vst.msk [vmem:[#allocation2 + $0x1] sm:$0x1] %vm54_vm0, %v629_v1  ;;  %55 = vst.msk [vmem:[#allocation2] sm:$0x1] %vm54_vm0, %v629_v1  ;;  %v683_v3 = vld [vmem:[#allocation5 + $0x4] sm:$0xf]  ;;  %v686_v4 = vunpack.c.l.bf16 %v681_v2  ;;  %533 = vset.pattern.permute.xlu1 %v630_v43  ;;  %534 = vset.pattern.permute.xlu0 %v630_v43 }
  0x20   :  { %v689_v5 = vunpack.c.l.bf16 %v683_v3  ;;  %v631_v44 = vmov 0.0   ;;  %v712_v54 = vshrl.u32 %v133_v53, 7  ;;  %vm633_vm2 = vmmov 0   ;;  %s634_s13 = smov [#allocation10]  }
  0x21   :  { %v75_v6 = vcombine.high %v686_v4, %v686_v4  ;;  %57 = vst.msk [vmem:[#allocation3] sm:$0x1] %vm54_vm0, %v631_v44  ;;  %58 = vst.msk [vmem:[#allocation3 + $0x1] sm:$0x1] %vm54_vm0, %v631_v44  ;;  %513 = vmatprep.subr.mxu0 %v631_v44  ;;  %518 = vmatprep.subr.mxu1 %v631_v44  ;;  %vm313_vm3 = vcmask 1041409   ;;  %vm315_vm4 = vcmask 31744  }
  0x22   :  { %v76_v7 = vcombine.high %v689_v5, %v689_v5  ;;  %59 = vst [vmem:[#allocation4] sm:$0xf] %v631_v44  ;;  %60 = vst [vmem:[#allocation4 + $0x4] sm:$0xf] %v631_v44  ;;  %v715_v55 = vsub.s32 0, %v712_v54  ;;  %515 = vmatprep.mubr.msk.f32.mxu0 %vm633_vm2, %v631_v44  ;;  %520 = vmatprep.mubr.msk.f32.mxu1 %vm633_vm2, %v631_v44  ;;  %s492_s14 = sshll.u32 %s634_s13, 4  ;;  %s493_s14 = int_to_ptr.vmem [resolvable:$true] %s492_s14 }
  0x23   :  { %v287_v44 = vld [vmem:[%s760_s4] sm:$0x3]  ;;  %vm484_vm5 = vcmask 58368   ;;  %s599_s15 = scalar_lea.vmem %s493_s14, 32  ;;  %p604_p11 = scmp.lt.s32.totalorder %s493_s14, %s493_s14 }
  0x24   :  { %p600_p10 = scmp.ne.s32.totalorder %s493_s14, %s599_s15  ;;  %p605_p12 = scmp.lt.s32.totalorder %s599_s15, %s599_s15 }
  0x26   :  { %v113_v45 = vld [vmem:[#allocation2 + $0x1] sm:$0x1]  ;;  %v112_v46 = vld [vmem:[#allocation2] sm:$0x1]  ;;  %p606_p13 = por %p605_p12, %p604_p11 }
  0x28   :  { %p607_p0 = pnand %p606_p13, %p600_p10 }
  0x90   :  { %v70_v8 = vpop.permute.xlu0 %69 }
  0x91   :  { %v79_v9 = vmul.f32 %v686_v4, %v70_v8  ;;  %v80_v10 = vmul.f32 %v75_v6, %v70_v8  ;;  %v81_v11 = vmul.f32 %v689_v5, %v70_v8  ;;  %v82_v12 = vmul.f32 %v76_v7, %v70_v8 }
  0x93   :  { %v84_v13 = vsel %vm83_vm1, %v79_v9, 0.0  ;;  %v91_v14 = vsel %vm83_vm1, %v80_v10, 0.0  ;;  %v98_v15 = vsel %vm83_vm1, %v81_v11, 0.0  ;;  %v105_v16 = vsel %vm83_vm1, %v82_v12, 0.0 }
  0x94   :  { %v85_v17 = vrot.slane %v84_v13, 4  ;;  %v92_v18 = vrot.slane %v91_v14, 4  ;;  %v99_v19 = vrot.slane %v98_v15, 4  ;;  %v106_v20 = vrot.slane %v105_v16, 4 }
  0x96   :  { %v100_v21 = vadd.f32 %v99_v19, %v98_v15  ;;  %v107_v22 = vadd.f32 %v106_v20, %v105_v16  ;;  %v86_v23 = vadd.f32 %v85_v17, %v84_v13  ;;  %v93_v24 = vadd.f32 %v92_v18, %v91_v14  ;;  %v158_v20 = vld [vmem:[#allocation3] sm:$0x1] }
  0x98   :  { %v101_v25 = vrot.slane %v100_v21, 2  ;;  %v108_v26 = vrot.slane %v107_v22, 2  ;;  %v87_v27 = vrot.slane %v86_v23, 2  ;;  %v94_v28 = vrot.slane %v93_v24, 2 }
  0x9a   :  { %v102_v29 = vadd.f32 %v101_v25, %v100_v21  ;;  %v109_v30 = vadd.f32 %v108_v26, %v107_v22  ;;  %v88_v31 = vadd.f32 %v87_v27, %v86_v23  ;;  %v95_v32 = vadd.f32 %v94_v28, %v93_v24  ;;  %v159_v24 = vld [vmem:[#allocation3 + $0x1] sm:$0x1]  ;;  %v176_v26 = vld [vmem:[#allocation4 + $0x4] sm:$0xf] }
  0x9b   :  { %v204_v22 = vrot.slane %v683_v3, 2  ;;  %v203_v3 = vrot.slane %v681_v2, 2 }
  0x9c   :  { %v103_v33 = vrot.slane %v102_v29, 1  ;;  %v110_v34 = vrot.slane %v109_v30, 1  ;;  %v89_v35 = vrot.slane %v88_v31, 1  ;;  %v96_v36 = vrot.slane %v95_v32, 1 }
  0x9d   :  { %v208_v28 = vunpack.c.l.bf16 %v204_v22 }
  0x9e   :  { %v104_v37 = vadd.f32 %v103_v33, %v102_v29  ;;  %v111_v38 = vadd.f32 %v110_v34, %v109_v30  ;;  %v90_v39 = vadd.f32 %v89_v35, %v88_v31  ;;  %v97_v40 = vadd.f32 %v96_v36, %v95_v32 }
  0xa0   :  { %v117_v41 = vmax.f32 %v104_v37, %v111_v38  ;;  %v114_v42 = vmax.f32 %v90_v39, %v97_v40 }
  0xa2   :  { %118 = vmax.xlane.f32.xlu1 %v117_v41  ;;  %115 = vmax.xlane.f32.xlu0 %v114_v42 }
 0x12b   :  { %v119_v47 = vpop.xlane.xlu1 %118  ;;  %v116_v48 = vpop.xlane.xlu0 %115 }
 0x12c   :  { %v121_v49 = vmax.f32 %v113_v45, %v119_v47  ;;  %v120_v50 = vmax.f32 %v112_v46, %v116_v48 }
 0x12e   :  { %v123_v51 = vsub.f32 %v113_v45, %v121_v49  ;;  %174 = vst.msk [vmem:[#allocation2 + $0x1] sm:$0x1] %vm54_vm0, %v121_v49  ;;  %v122_v52 = vsub.f32 %v112_v46, %v120_v50  ;;  %173 = vst.msk [vmem:[#allocation2] sm:$0x1] %vm54_vm0, %v120_v50  ;;  %130 = vperm.xlu1 %533, %v120_v50  }
 0x130   :  { %v126_v8 = vmul.f32 1.442695, %v123_v51  ;;  %v124_v15 = vmul.f32 1.442695, %v122_v52 }
 0x132   :  { %139 = vperm.xlu1 %533, %v121_v49  }
 0x1a9   :  { %v131_v56 = vpop.permute.xlu1 %130 }
 0x1aa   :  { %v136_v57 = vrot.slane %v131_v56, %v715_v55 }
 0x1ac   :  { %v146_v58 = vsub.f32 %v90_v39, %v136_v57  ;;  %v147_v59 = vsub.f32 %v97_v40, %v136_v57  ;;  %v207_v39 = vunpack.c.l.bf16 %v203_v3 }
 0x1ad   :  { %v140_v60 = vpop.permute.xlu1 %139 }
 0x1ae   :  { %v150_v61 = vmul.f32 1.442695, %v146_v58  ;;  %v152_v62 = vmul.f32 1.442695, %v147_v59  ;;  %v145_v63 = vrot.slane %v140_v60, %v715_v55 }
 0x1b0   :  { %535 = vpow2.f32 %v150_v61  ;;  %v148_v0 = vsub.f32 %v104_v37, %v145_v63  ;;  %v149_v1 = vsub.f32 %v111_v38, %v145_v63  ;;  %v175_v37 = vld [vmem:[#allocation4] sm:$0xf] }
 0x1b1   :  { %537 = vpow2.f32 %v152_v62 }
 0x1b2   :  { %v154_v6 = vmul.f32 1.442695, %v148_v0  ;;  %v156_v7 = vmul.f32 1.442695, %v149_v1  ;;  %v274_v0 = vsub.s32 1, %v712_v54 }
 0x1b4   :  { %539 = vpow2.f32 %v154_v6 }
 0x1b5   :  { %541 = vpow2.f32 %v156_v7 }
 0x1b6   :  { %543 = vpow2.f32 %v126_v8 }
 0x1b7   :  { %545 = vpow2.f32 %v124_v15 }
 0x1bd   :  { %v536_v9 = vpop.eup %535 }
 0x1be   :  { %v538_v10 = vpop.eup %537  ;;  %v197_v41 = vmul.f32 %v536_v9, %v686_v4  ;;  %v632_v4 = vmov 1966171168  }
 0x1bf   :  { %v162_v11 = vadd.f32 %v538_v10, %v536_v9  ;;  %v209_v45 = vmul.f32 %v538_v10, %v207_v39  ;;  %v252_v52 = vunpack.c.l.s4 %v632_v4  ;;  %v283_v10 = vld [vmem:[%s758_s2] sm:$0x3] }
 0x1c1   :  { %v540_v12 = vpop.eup %539  ;;  %163 = vadd.xlane.f32.xlu1 %v162_v11  ;;  %v253_v57 = vunpack.c.0.s8 %v252_v52  ;;  %v284_v11 = vunpack.c.l.bf16 %v283_v10 }
 0x1c2   :  { %v542_v13 = vpop.eup %541  ;;  %v198_v32 = vmul.f32 %v540_v12, %v689_v5 }
 0x1c3   :  { %v165_v14 = vadd.f32 %v542_v13, %v540_v12  ;;  %v544_v16 = vpop.eup %543  ;;  %v210_v34 = vmul.f32 %v542_v13, %v208_v28  ;;  %v256_v60 = vsub.s32 %v253_v57, %v712_v54  ;;  %514 = vmatpush3.msk.msra.mxu0 %vm83_vm1, %v284_v11 }
 0x1c4   :  { %v186_v17 = vrot.slane %v544_v16, %v715_v55  ;;  %v546_v18 = vpop.eup %545  ;;  %v161_v27 = vmul.f32 %v544_v16, %v159_v24  ;;  %v304_v16 = vand.u32 127, %v133_v53  ;;  %v285_v24 = vld [vmem:[#allocation8] sm:$0x1] }
 0x1c5   :  { %166 = vadd.xlane.f32.xlu0 %v165_v14  ;;  %v182_v19 = vrot.slane %v546_v18, %v715_v55  ;;  %v160_v21 = vmul.f32 %v546_v18, %v158_v20  ;;  %v286_v53 = vunpack.c.l.bf16 %v285_v24 }
 0x1d2   :  { %192 = vperm.xlu1 %533, %v186_v17   ;;  %v307_v17 = vsub.s32 %v304_v16, %v712_v54  ;;  %v294_v54 = vrot.slane %v286_v53, %v715_v55 }
 0x1db   :  { %188 = vperm.xlu0 %534, %v182_v19  }
 0x24a   :  { %v164_v23 = vpop.xlane.xlu1 %163 }
 0x24b   :  { %v168_v25 = vadd.f32 %v164_v23, %v160_v21  ;;  %v288_v23 = vunpack.c.l.bf16 %v287_v44 }
 0x24d   :  { %171 = vst.msk [vmem:[#allocation3] sm:$0x1] %vm54_vm0, %v168_v25  ;;  %519 = vmatpush3.msk.msra.mxu1 %vm83_vm1, %v288_v23 }
 0x24e   :  { %v167_v29 = vpop.xlane.xlu0 %166  ;;  %v193_v30 = vpop.permute.xlu1 %192 }
 0x24f   :  { %v169_v31 = vadd.f32 %v167_v29, %v161_v27  ;;  %v196_v33 = vmul.f32 %v193_v30, %v176_v26 }
 0x251   :  { %172 = vst.msk [vmem:[#allocation3 + $0x1] sm:$0x1] %vm54_vm0, %v169_v31  ;;  %v200_v35 = vadd.f32 %v198_v32, %v196_v33  ;;  %v289_v33 = vld [vmem:[%s761_s5] sm:$0x1] }
 0x253   :  { %v212_v36 = vadd.f32 %v210_v34, %v200_v35  ;;  %v290_v34 = vunpack.c.l.bf16 %v289_v33 }
 0x254   :  { %v226_v38 = vld [vmem:[#allocation3] sm:$0x1] }
 0x255   :  { %214 = vst [vmem:[#allocation4 + $0x4] sm:$0xf] %v212_v36  ;;  %547 = vrcp.f32 %v226_v38  ;;  %v401_v35 = vrot.slane %v290_v34, %v715_v55 }
 0x256   :  { %v189_v40 = vpop.permute.xlu0 %188 }
 0x257   :  { %v195_v42 = vmul.f32 %v189_v40, %v175_v37 }
 0x258   :  { %v227_v43 = vld [vmem:[#allocation3 + $0x1] sm:$0x1] }
 0x259   :  { %v199_v5 = vadd.f32 %v197_v41, %v195_v42  ;;  %549 = vrcp.f32 %v227_v43 }
 0x25b   :  { %v211_v46 = vadd.f32 %v209_v45, %v199_v5 }
 0x25c   :  { %v219_v50 = vld [vmem:[#allocation4 + $0x4] sm:$0xf] }
 0x25d   :  { %213 = vst [vmem:[#allocation4] sm:$0xf] %v211_v46  ;;  %v223_v51 = vsel %vm83_vm1, %v219_v50, 0.0 }
 0x262   :  { %v548_v47 = vpop.eup %547 }
 0x263   :  { %232 = vperm.xlu1 %533, %v548_v47  }
 0x264   :  { %v218_v48 = vld [vmem:[#allocation4] sm:$0xf] }
 0x265   :  { %v220_v2 = vsel %vm83_vm1, %v218_v48, 0.0 }
 0x266   :  { %v550_v49 = vpop.eup %549  ;;  %221 = vadd.xlane.f32.xlu0 %v220_v2 }
 0x267   :  { %241 = vperm.xlu1 %533, %v550_v49  }
 0x28b   :  { %224 = vadd.xlane.f32.xlu1 %v223_v51 }
 0x2de   :  { %v233_v56 = vpop.permute.xlu1 %232 }
 0x2df   :  { %v238_v59 = vrot.slane %v233_v56, %v715_v55 }
 0x2e2   :  { %v242_v58 = vpop.permute.xlu1 %241 }
 0x2e3   :  { %v247_v61 = vrot.slane %v242_v58, %v715_v55 }
 0x2e5   :  { %v250_v62 = vcombine.low %v238_v59, %v247_v61 }
 0x2e7   :  { %v257_v63 = vrot.slane %v250_v62, %v256_v60 }
 0x2e9   :  { %v264_v1 = vrot.slane %v257_v63, %v256_v60 }
 0x2eb   :  { %v275_v6 = vrot.slane %v264_v1, %v274_v0  ;;  %v268_v7 = vrot.slane %v264_v1, %v715_v55 }
 0x2ed   :  { %277 = vbcast.lane.b32.xlu1 %v275_v6, 256  ;;  %270 = vbcast.lane.b32.xlu0 %v268_v7, 256 }
 0x2ef   :  { %v222_v8 = vpop.xlane.xlu0 %221 }
 0x314   :  { %v225_v9 = vpop.xlane.xlu1 %224 }
 0x35f   :  { %v271_v12 = vpop.permute.xlu0 %270  ;;  %v278_v13 = vpop.permute.xlu1 %277 }
 0x360   :  { %v281_v14 = vmul.f32 %v271_v12, %v222_v8  ;;  %v282_v15 = vmul.f32 %v278_v13, %v225_v9 }
 0x362   :  { %298 = vperm.xlu0 %534, %v281_v14   ;;  %301 = vperm.xlu1 %533, %v282_v15  }
 0x3dd   :  { %v299_v18 = vpop.permute.xlu0 %298  ;;  %v302_v19 = vpop.permute.xlu1 %301 }
 0x3de   :  { %v308_v20 = vrot.slane %v299_v18, %v307_v17  ;;  %v312_v21 = vrot.slane %v302_v19, %v307_v17 }
 0x3e0   :  { %v314_v22 = vsel %vm313_vm3, %v312_v21, %v308_v20 }
 0x3e1   :  { %516 = vmatmul.mubr.msk.f32.vlgmr.msra.gmra.mxu0 %vm315_vm4, %v314_v22 }
 0x4a1   :  { %v387_v25 = vpop.f32.mrf.mxu0 }
 0x4a2   :  { %v388_v26 = vadd.f32 %v387_v25, %v294_v54 }
 0x4a3   :  { %v517_v27 = vpop.f32.mrf.mxu0 }
 0x4a4   :  { %v505_v28 = vmul.f32 -1.442695, %v388_v26 }
 0x4a6   :  { %551 = vpow2.f32 %v505_v28 }
 0x4b3   :  { %v552_v29 = vpop.eup %551 }
 0x4b4   :  { %v394_v30 = vadd.f32 1.0, %v552_v29 }
 0x4b6   :  { %553 = vrcp.f32 %v394_v30 }
 0x4c3   :  { %v554_v31 = vpop.eup %553 }
 0x4c4   :  { %v397_v32 = vmul.f32 %v554_v31, %v388_v26 }
 0x4c6   :  { %521 = vmatmul.mubr.msk.f32.vlgmr.msra.gmra.mxu1 %vm315_vm4, %v397_v32 }
 0x586   :  { %v474_v3 = vpop.f32.mrf.mxu1 }
 0x587   :  { %v475_v36 = vadd.f32 %v474_v3, %v401_v35 }
 0x588   :  { %v522_v37 = vpop.f32.mrf.mxu1 }
 0x589   :  { %v508_v38 = vmul.f32 -1.442695, %v475_v36 }
 0x58b   :  { %555 = vpow2.f32 %v508_v38 }
 0x598   :  { %v556_v39 = vpop.eup %555 }
 0x599   :  { %v481_v40 = vadd.f32 1.0, %v556_v39 }
 0x59b   :  { %557 = vrcp.f32 %v481_v40 }
 0x5a8   :  { %v558_v41 = vpop.eup %557 }
 0x5a9   :  { %485 = vst.msk [vmem:[#allocation10] sm:$0x3] %vm484_vm5, %v558_v41 }
 0x5aa   :  { %610 = shalt.err (!%p607_p0)
}
 0x5ab   :  { %495 = dma.vmem_to_hbm [thread:$0]  %s493_s14, 32, %s762_s6, [#allocation7]  }
 0x5ac   :  { %623 = dma.done.wait [#allocation7], 32  }
 0x5ad   :  { %624 = vsyncadd [#allocation7], 4294967264 }
 0x5ae   :  { %499 = vsyncpa [#allocation6], 1 }
 0x5af   :  { %500 = vsyncpa [#allocation9], 1 }
 0x5b0   :  { %501 = vsyncpa [#allocation7], 1 }

</bundles_post_ra>
